<compile_context>
chip_gen: v7x
topology: tpu7x:2x2x1
jax: 0.10.0
libtpu: 0.0.40
codegen_flags: <defaults>
</compile_context>

<pallas_src>
import jax
import jax.numpy as jnp
from jax.experimental import pallas as pl
from jax.experimental.pallas import tpu as pltpu

EPS = 1e-5
_LANES = 128


def _bn_train(h, gamma, beta):
    # BatchNorm1d, training mode: biased batch statistics over axis 0.
    mean = jnp.mean(h, axis=0, keepdims=True)
    var = jnp.mean((h - mean) ** 2, axis=0, keepdims=True)
    inv = jax.lax.rsqrt(var + EPS)
    return (h - mean) * inv * gamma + beta


def _mlp_blocks(x, w1, w2, vecs, u0, u1):
    """Two (Linear -> BN(train) -> ReLU) blocks. Linear biases omitted: they are
    mathematically cancelled by the BN mean subtraction."""
    h1 = jnp.dot(x, w1, preferred_element_type=jnp.float32)
    h1 = _bn_train(h1, vecs[0:1, :u0], vecs[1:2, :u0])
    h1 = jnp.maximum(h1, 0.0)

    h2 = jnp.dot(h1, w2, preferred_element_type=jnp.float32)
    h2 = _bn_train(h2, vecs[2:3, :u1], vecs[3:4, :u1])
    h2 = jnp.maximum(h2, 0.0)
    return h2


def unit_net_kernel_vpu_head(x_ref, w1_ref, w2_ref, vecs_ref, o_ref):
    """num_features == 1: head as VPU multiply + lane reduce (no N=1 MXU matmul).
    Packed vecs rows: 0=g1, 1=be1, 2=g2, 3=be2, 4=b3, 5=w3 column."""
    u0 = w1_ref.shape[1]
    u1 = w2_ref.shape[1]
    vecs = vecs_ref[...]

    h2 = _mlp_blocks(x_ref[...], w1_ref[...], w2_ref[...], vecs, u0, u1)

    w3_row = vecs[5:6, :u1]                     # (1, u1) broadcast over batch
    out = jnp.sum(h2 * w3_row, axis=-1, keepdims=True) + vecs[4:5, :1]
    o_ref[...] = out.astype(o_ref.dtype)


def unit_net_kernel_mxu_head(x_ref, w1_ref, w2_ref, w3_ref, vecs_ref, o_ref):
    """General num_features: head on the MXU."""
    u0 = w1_ref.shape[1]
    u1 = w2_ref.shape[1]
    f = w3_ref.shape[1]
    vecs = vecs_ref[...]

    h2 = _mlp_blocks(x_ref[...], w1_ref[...], w2_ref[...], vecs, u0, u1)

    out = jnp.dot(h2, w3_ref[...], preferred_element_type=jnp.float32) + vecs[4:5, :f]
    o_ref[...] = out.astype(o_ref.dtype)


def _pack_vecs(params, num_features):
    """Pack all per-feature vectors into a single (8, 128) f32 VMEM tile."""
    u0 = params["g1"].shape[-1]
    u1 = params["g2"].shape[-1]
    vecs = jnp.zeros((8, _LANES), jnp.float32)
    vecs = vecs.at[0, :u0].set(params["g1"].reshape(-1))
    vecs = vecs.at[1, :u0].set(params["be1"].reshape(-1))
    vecs = vecs.at[2, :u1].set(params["g2"].reshape(-1))
    vecs = vecs.at[3, :u1].set(params["be2"].reshape(-1))
    vecs = vecs.at[4, :num_features].set(params["b3"].reshape(-1))
    if num_features == 1:
        vecs = vecs.at[5, :u1].set(params["w3"].reshape(-1))
    return vecs


def _pad(v, m):
    return ((v + m - 1) // m) * m


def _vmem_estimate(batch, d_in, u0, u1, f):
    """Rough padded-f32 VMEM budget (with headroom) for the explicit limit."""
    def tile(r, c):
        return _pad(max(r, 1), 8) * _pad(max(c, 1), _LANES) * 4

    total = (
        tile(batch, d_in)            # x
        + tile(d_in, u0)             # w1
        + tile(u0, u1)               # w2
        + tile(u1, f)                # w3 (worst case, even if packed)
        + tile(8, _LANES)            # packed vectors
        + tile(batch, f)             # output
        + 3 * tile(batch, max(u0, u1))  # activation temporaries
    )
    total *= 2  # double-buffer / scheduling headroom
    return int(min(max(total, 4 << 20), 32 << 20))  # safe on v5e/v6e/v7x


def unit_net_forward(x, params):
    """x: (B, input_size) float32. params: dict of weights (see init_params)."""
    B, d_in = x.shape
    u0 = params["w1"].shape[1]
    u1 = params["w2"].shape[1]
    num_features = params["w3"].shape[1]
    assert u0 <= _LANES and u1 <= _LANES and num_features <= _LANES, (
        "feature widths must fit one lane tile (<=128) for the packed-vector layout")

    vecs = _pack_vecs(params, num_features)
    vmem_spec = pl.BlockSpec(memory_space=pltpu.MemorySpace.VMEM)

    if num_features == 1:
        kernel = unit_net_kernel_vpu_head
        args = (x, params["w1"], params["w2"], vecs)
    else:
        kernel = unit_net_kernel_mxu_head
        args = (x, params["w1"], params["w2"], params["w3"], vecs)

    return pl.pallas_call(
        kernel,
        out_shape=jax.ShapeDtypeStruct((B, num_features), jnp.float32),
        in_specs=[vmem_spec] * len(args),
        out_specs=vmem_spec,
        compiler_params=pltpu.CompilerParams(
            vmem_limit_bytes=_vmem_estimate(B, d_in, u0, u1, num_features)),
        # Single grid point: BN couples the whole batch, which easily fits VMEM here.
    )(*args)


def init_params(key, input_size=24, units=(50, 50), num_features=1):
    """Deterministic init mimicking PyTorch defaults:
    Linear: U(-1/sqrt(fan_in), 1/sqrt(fan_in)); BatchNorm1d: gamma=1, beta=0.
    Weights stored as (in, out); biases / BN params stored as (1, out)."""
    ks = jax.random.split(key, 6)
    u0, u1 = units

    def lin(k, fan_in, fan_out):
        kw, kb = jax.random.split(k)
        bound = 1.0 / jnp.sqrt(jnp.float32(fan_in))
        w = jax.random.uniform(kw, (fan_in, fan_out), jnp.float32, -bound, bound)
        b = jax.random.uniform(kb, (1, fan_out), jnp.float32, -bound, bound)
        return w, b

    w1, b1 = lin(ks[0], input_size, u0)
    w2, b2 = lin(ks[1], u0, u1)
    w3, b3 = lin(ks[2], u1, num_features)
    return {
        "w1": w1, "b1": b1,
        "g1": jnp.ones((1, u0), jnp.float32), "be1": jnp.zeros((1, u0), jnp.float32),
        "w2": w2, "b2": b2,
        "g2": jnp.ones((1, u1), jnp.float32), "be2": jnp.zeros((1, u1), jnp.float32),
        "w3": w3, "b3": b3,
    }


def unit_net_reference(x, p):
    """Pure-JAX reference matching the PyTorch forward (train-mode BN),
    including the b1/b2 bias adds that BN cancels."""
    h = x @ p["w1"] + p["b1"]
    h = _bn_train(h, p["g1"], p["be1"])
    h = jnp.maximum(h, 0.0)
    h = h @ p["w2"] + p["b2"]
    h = _bn_train(h, p["g2"], p["be2"])
    h = jnp.maximum(h, 0.0)
    return h @ p["w3"] + p["b3"]


if __name__ == "__main__":
    key = jax.random.PRNGKey(0)
    kx, kp = jax.random.split(key)

    B, INPUT_SIZE, NUM_FEATURES = 8, 24, 1
    x = jax.random.normal(kx, (B, INPUT_SIZE), jnp.float32)
    params = init_params(kp, input_size=INPUT_SIZE, units=(50, 50),
                         num_features=NUM_FEATURES)

    out = unit_net_forward(x, params)
    out = jax.block_until_ready(out)

    ref = unit_net_reference(x, params)
    assert out.shape == (B, NUM_FEATURES)
    assert jnp.allclose(out, ref, atol=1e-4, rtol=1e-4)

    print("KERNEL_OK")
</pallas_src>

<mosaic_0001>
module attributes {stable_mosaic.version = 11 : i64} {
  func.func @unit_net_kernel_vpu_head(%arg0: memref<8x24xf32, #tpu.memory_space<vmem>>, %arg1: memref<24x50xf32, #tpu.memory_space<vmem>>, %arg2: memref<50x50xf32, #tpu.memory_space<vmem>>, %arg3: memref<8x128xf32, #tpu.memory_space<vmem>>, %arg4: memref<8x1xf32, #tpu.memory_space<vmem>>) attributes {dimension_semantics = [], scalar_prefetch = 0 : i64, scratch_operands = 0 : i64, tpu.core_type = #tpu.core_type<tc>} {
    %c0 = arith.constant 0 : index
    %c0_0 = arith.constant 0 : index
    %0 = vector.load %arg3[%c0, %c0_0] : memref<8x128xf32, #tpu.memory_space<vmem>>, vector<8x128xf32>
    %c0_1 = arith.constant 0 : index
    %c0_2 = arith.constant 0 : index
    %1 = vector.load %arg0[%c0_1, %c0_2] : memref<8x24xf32, #tpu.memory_space<vmem>>, vector<8x24xf32>
    %c0_3 = arith.constant 0 : index
    %c0_4 = arith.constant 0 : index
    %2 = vector.load %arg1[%c0_3, %c0_4] : memref<24x50xf32, #tpu.memory_space<vmem>>, vector<24x50xf32>
    %c0_5 = arith.constant 0 : index
    %c0_6 = arith.constant 0 : index
    %3 = vector.load %arg2[%c0_5, %c0_6] : memref<50x50xf32, #tpu.memory_space<vmem>>, vector<50x50xf32>
    %cst = arith.constant dense<0.000000e+00> : vector<8x50xf32>
    %4 = tpu.matmul %1, %2, %cst {dimension_numbers = #tpu.dot_dimension_numbers<[1], [0], [0], [1], [0, 0, 1, 1], [], []>} : vector<8x24xf32>, vector<24x50xf32>, vector<8x50xf32> -> vector<8x50xf32>
    %5 = vector.extract_strided_slice %0 {offsets = [0, 0], sizes = [1, 50], strides = [1, 1]} : vector<8x128xf32> to vector<1x50xf32>
    %6 = vector.extract_strided_slice %0 {offsets = [1, 0], sizes = [1, 50], strides = [1, 1]} : vector<8x128xf32> to vector<1x50xf32>
    %cst_7 = arith.constant dense<0.000000e+00> : vector<50xf32>
    %7 = vector.multi_reduction <add>, %4, %cst_7 [0] : vector<8x50xf32> to vector<50xf32>
    %8 = vector.shape_cast %7 : vector<50xf32> to vector<1x50xf32>
    %cst_8 = arith.constant 8.000000e+00 : f32
    %9 = vector.broadcast %cst_8 : f32 to vector<1x50xf32>
    %10 = arith.divf %8, %9 : vector<1x50xf32>
    %11 = vector.broadcast %10 : vector<1x50xf32> to vector<8x50xf32>
    %12 = arith.subf %4, %11 : vector<8x50xf32>
    %13 = arith.mulf %12, %12 : vector<8x50xf32>
    %cst_9 = arith.constant dense<0.000000e+00> : vector<50xf32>
    %14 = vector.multi_reduction <add>, %13, %cst_9 [0] : vector<8x50xf32> to vector<50xf32>
    %15 = vector.shape_cast %14 : vector<50xf32> to vector<1x50xf32>
    %cst_10 = arith.constant 8.000000e+00 : f32
    %16 = vector.broadcast %cst_10 : f32 to vector<1x50xf32>
    %17 = arith.divf %15, %16 : vector<1x50xf32>
    %cst_11 = arith.constant 9.99999974E-6 : f32
    %18 = vector.broadcast %cst_11 : f32 to vector<1x50xf32>
    %19 = arith.addf %17, %18 : vector<1x50xf32>
    %20 = math.rsqrt %19 : vector<1x50xf32>
    %21 = vector.broadcast %10 : vector<1x50xf32> to vector<8x50xf32>
    %22 = arith.subf %4, %21 : vector<8x50xf32>
    %23 = vector.broadcast %20 : vector<1x50xf32> to vector<8x50xf32>
    %24 = arith.mulf %22, %23 : vector<8x50xf32>
    %25 = vector.broadcast %5 : vector<1x50xf32> to vector<8x50xf32>
    %26 = arith.mulf %24, %25 : vector<8x50xf32>
    %27 = vector.broadcast %6 : vector<1x50xf32> to vector<8x50xf32>
    %28 = arith.addf %26, %27 : vector<8x50xf32>
    %cst_12 = arith.constant 0.000000e+00 : f32
    %29 = vector.broadcast %cst_12 : f32 to vector<8x50xf32>
    %30 = arith.maximumf %28, %29 : vector<8x50xf32>
    %cst_13 = arith.constant dense<0.000000e+00> : vector<8x50xf32>
    %31 = tpu.matmul %30, %3, %cst_13 {dimension_numbers = #tpu.dot_dimension_numbers<[1], [0], [0], [1], [0, 0, 1, 1], [], []>} : vector<8x50xf32>, vector<50x50xf32>, vector<8x50xf32> -> vector<8x50xf32>
    %32 = vector.extract_strided_slice %0 {offsets = [2, 0], sizes = [1, 50], strides = [1, 1]} : vector<8x128xf32> to vector<1x50xf32>
    %33 = vector.extract_strided_slice %0 {offsets = [3, 0], sizes = [1, 50], strides = [1, 1]} : vector<8x128xf32> to vector<1x50xf32>
    %cst_14 = arith.constant dense<0.000000e+00> : vector<50xf32>
    %34 = vector.multi_reduction <add>, %31, %cst_14 [0] : vector<8x50xf32> to vector<50xf32>
    %35 = vector.shape_cast %34 : vector<50xf32> to vector<1x50xf32>
    %cst_15 = arith.constant 8.000000e+00 : f32
    %36 = vector.broadcast %cst_15 : f32 to vector<1x50xf32>
    %37 = arith.divf %35, %36 : vector<1x50xf32>
    %38 = vector.broadcast %37 : vector<1x50xf32> to vector<8x50xf32>
    %39 = arith.subf %31, %38 : vector<8x50xf32>
    %40 = arith.mulf %39, %39 : vector<8x50xf32>
    %cst_16 = arith.constant dense<0.000000e+00> : vector<50xf32>
    %41 = vector.multi_reduction <add>, %40, %cst_16 [0] : vector<8x50xf32> to vector<50xf32>
    %42 = vector.shape_cast %41 : vector<50xf32> to vector<1x50xf32>
    %cst_17 = arith.constant 8.000000e+00 : f32
    %43 = vector.broadcast %cst_17 : f32 to vector<1x50xf32>
    %44 = arith.divf %42, %43 : vector<1x50xf32>
    %cst_18 = arith.constant 9.99999974E-6 : f32
    %45 = vector.broadcast %cst_18 : f32 to vector<1x50xf32>
    %46 = arith.addf %44, %45 : vector<1x50xf32>
    %47 = math.rsqrt %46 : vector<1x50xf32>
    %48 = vector.broadcast %37 : vector<1x50xf32> to vector<8x50xf32>
    %49 = arith.subf %31, %48 : vector<8x50xf32>
    %50 = vector.broadcast %47 : vector<1x50xf32> to vector<8x50xf32>
    %51 = arith.mulf %49, %50 : vector<8x50xf32>
    %52 = vector.broadcast %32 : vector<1x50xf32> to vector<8x50xf32>
    %53 = arith.mulf %51, %52 : vector<8x50xf32>
    %54 = vector.broadcast %33 : vector<1x50xf32> to vector<8x50xf32>
    %55 = arith.addf %53, %54 : vector<8x50xf32>
    %cst_19 = arith.constant 0.000000e+00 : f32
    %56 = vector.broadcast %cst_19 : f32 to vector<8x50xf32>
    %57 = arith.maximumf %55, %56 : vector<8x50xf32>
    %58 = vector.extract_strided_slice %0 {offsets = [5, 0], sizes = [1, 50], strides = [1, 1]} : vector<8x128xf32> to vector<1x50xf32>
    %59 = vector.broadcast %58 : vector<1x50xf32> to vector<8x50xf32>
    %60 = arith.mulf %57, %59 : vector<8x50xf32>
    %cst_20 = arith.constant dense<0.000000e+00> : vector<8xf32>
    %61 = vector.multi_reduction <add>, %60, %cst_20 [1] : vector<8x50xf32> to vector<8xf32>
    %62 = vector.shape_cast %61 : vector<8xf32> to vector<8x1xf32>
    %63 = vector.extract_strided_slice %0 {offsets = [4, 0], sizes = [1, 1], strides = [1, 1]} : vector<8x128xf32> to vector<1x1xf32>
    %64 = vector.broadcast %63 : vector<1x1xf32> to vector<8x1xf32>
    %65 = arith.addf %62, %64 : vector<8x1xf32>
    %c0_21 = arith.constant 0 : index
    %c0_22 = arith.constant 0 : index
    %66 = vector.load %arg4[%c0_21, %c0_22] : memref<8x1xf32, #tpu.memory_space<vmem>>, vector<8x1xf32>
    tpu.vector_store %arg4[%c0_21, %c0_22], %65 {strides = array<i32>} : memref<8x1xf32, #tpu.memory_space<vmem>>, vector<8x1xf32>,
    return
  }
}

</mosaic_0001>

<bundles_post_ra>
// kernel: tpu_custom_call.1
= control target key start
LH: loop header
LB: loop body
LE: loop exit
PB: predicated region body
PF: predicated region fallthrough
CT: control target
= control target key end

     0   :  { %9 = vsyncpa [#allocation3], 0  ;;  %s528_s0 = inlined_call_operand.hbm [shape: f32[8,24], index: 0, kind: input, shape index: {}]   ;;  %s529_s1 = inlined_call_operand.hbm [shape: f32[24,50], index: 1, kind: input, shape index: {}]   ;;  %s530_s2 = inlined_call_operand.hbm [shape: f32[50,50], index: 2, kind: input, shape index: {}]   ;;  %s531_s3 = inlined_call_operand.vmem [shape: f32[8,128], index: 3, kind: input, shape index: {}]   ;;  %s532_s4 = inlined_call_operand.vmem [shape: f32[8,1], index: 4, kind: output, shape index: {}]  }
   0x1   :  { %10 = vsyncpa [#allocation5], 0  ;;  %s441_s15 = smov [#allocation4]   ;;  %s371_s19 = scalar_lea.hbm %s529_s1, 384 }
   0x2   :  { %s26_s16 = sshll.u32 %s441_s15, 4  ;;  %p372_p0 = scmp.ne.s32.totalorder %s529_s1, %s371_s19  ;;  %s27_s16 = int_to_ptr.vmem [resolvable:$true] %s26_s16 }
   0x3   :  { %p375_p1 = scmp.lt.u32.totalorder %s371_s19, %s529_s1 }
   0x5   :  { %p377_p2 = pnand %p375_p1, %p372_p0 }
   0x7   :  { %380 = shalt.err (!%p377_p2)
}
   0x8   :  { %s381_s24 = scalar_lea.vmem %s27_s16, 384  ;;  %p386_p4 = scmp.lt.s32.totalorder %s27_s16, %s27_s16 }
   0x9   :  { %p382_p3 = scmp.ne.s32.totalorder %s27_s16, %s381_s24  ;;  %p387_p5 = scmp.lt.s32.totalorder %s381_s24, %s381_s24 }
   0xb   :  { %p388_p6 = por %p387_p5, %p386_p4 }
   0xd   :  { %p389_p7 = pnand %p388_p6, %p382_p3 }
   0xf   :  { %392 = shalt.err (!%p389_p7)
}
  0x10   :  { %s442_s25 = smov 128   ;;  %s443_s26 = smov 8  }
  0x11   :  { %32 = dma.hbm_to_vmem [thread:$0]  %s529_s1, 384, %s27_s16, [#allocation5], %s442_s25, %s442_s25, %s443_s26  }
  0x12   :  { %s444_s29 = smov [#allocation2]   ;;  %s445_s5 = smov [#allocation6]  }
  0x13   :  { %s17_s30 = sshll.u32 %s444_s29, 4  ;;  %s38_s6 = sshll.u32 %s445_s5, 4  ;;  %s18_s30 = int_to_ptr.vmem [resolvable:$true] %s17_s30  ;;  %s39_s6 = int_to_ptr.vmem [resolvable:$true] %s38_s6 }
  0x14   :  { %s393_s9 = scalar_lea.hbm %s528_s0, 128 }
  0x15   :  { %p394_p8 = scmp.ne.s32.totalorder %s528_s0, %s393_s9  ;;  %p397_p9 = scmp.lt.u32.totalorder %s393_s9, %s528_s0 }
  0x17   :  { %p399_p10 = pnand %p397_p9, %p394_p8 }
  0x19   :  { %402 = shalt.err (!%p399_p10)
}
  0x1a   :  { %s403_s1 = scalar_lea.vmem %s18_s30, 128  ;;  %p408_p12 = scmp.lt.s32.totalorder %s18_s30, %s18_s30 }
  0x1b   :  { %p404_p11 = scmp.ne.s32.totalorder %s18_s30, %s403_s1  ;;  %p409_p13 = scmp.lt.s32.totalorder %s403_s1, %s403_s1 }
  0x1d   :  { %p410_p0 = por %p409_p13, %p408_p12 }
  0x1f   :  { %p411_p1 = pnand %p410_p0, %p404_p11 }
  0x21   :  { %414 = shalt.err (!%p411_p1)
}
  0x22   :  { %20 = dma.hbm_to_vmem [thread:$0]  %s528_s0, 128, %s18_s30, [#allocation3]  }
  0x23   :  { %s415_s18 = scalar_lea.hbm %s530_s2, 896 }
  0x24   :  { %p416_p2 = scmp.ne.s32.totalorder %s530_s2, %s415_s18  ;;  %p419_p3 = scmp.lt.u32.totalorder %s415_s18, %s530_s2 }
  0x26   :  { %p421_p4 = pnand %p419_p3, %p416_p2 }
  0x28   :  { %424 = shalt.err (!%p421_p4)
}
  0x29   :  { %s425_s23 = scalar_lea.vmem %s39_s6, 896  ;;  %p430_p6 = scmp.lt.s32.totalorder %s39_s6, %s39_s6 }
  0x2a   :  { %p426_p5 = scmp.ne.s32.totalorder %s39_s6, %s425_s23  ;;  %p431_p7 = scmp.lt.s32.totalorder %s425_s23, %s425_s23 }
  0x2c   :  { %p432_p8 = por %p431_p7, %p430_p6 }
  0x2e   :  { %p433_p9 = pnand %p432_p8, %p426_p5 }
  0x30   :  { %436 = shalt.err (!%p433_p9)
}
  0x31   :  { %44 = dma.hbm_to_vmem [thread:$0]  %s530_s2, 896, %s39_s6, [#allocation5], %s442_s25, %s442_s25, %s443_s26  }
  0x32   :  { %437 = dma.done.wait [#allocation3], 128  }
  0x33   :  { %438 = vsyncadd [#allocation3], 4294967168 }
  0x34   :  { %439 = dma.done.wait [#allocation5], 1280  }
  0x35   :  { %440 = vsyncadd [#allocation5], 4294966016  ;;  %v446_v0 = vmov 0.0|0.0   ;;  %vm447_vm0 = vmmov 0   ;;  %v448_v1 = vmov 0.0   ;;  %v58_v2 = vld [vmem:[#allocation4] sm:$0xff]  ;;  %v165_v37 = vlaneseq }
  0x36   :  { %347 = vmatprep.subr.bf16.mxu0 %v446_v0  ;;  %327 = vmatprep.mubr.msk.f32.mxu0 %vm447_vm0, %v448_v1  ;;  %v59_v3 = vld [vmem:[#allocation4 + $0x8] sm:$0xff]  ;;  %v60_v5 = vld [vmem:[#allocation4 + $0x10] sm:$0xff]  ;;  %v57_v6 = vld [vmem:[#allocation2] sm:$0xff]  ;;  %vm68_vm1 = vcmask 195584   ;;  %vm179_vm2 = vcmask 1041408   ;;  %vm142_vm3 = vcmask 408576  }
  0x37   :  { %350 = vmatprep.subr.bf16.mxu1 %v446_v0  ;;  %344 = vmatprep.mubr.msk.f32.mxu1 %vm447_vm0, %v448_v1  ;;  %v348_v4 = vpack.c.bf16 %v59_v3, %v58_v2  ;;  %v61_v7 = vld [vmem:[#allocation6] sm:$0xff]  ;;  %v62_v8 = vld [vmem:[#allocation6 + $0x8] sm:$0xff]  ;;  %v63_v10 = vld [vmem:[#allocation6 + $0x10] sm:$0xff]  ;;  %v166_v39 = vshrl.u32 %v165_v37, 7  ;;  %vm298_vm4 = vcmask 7168  }
  0x38   :  { %v351_v9 = vpack.c.bf16 %v62_v8, %v61_v7  ;;  %v64_v11 = vld [vmem:[#allocation6 + $0x18] sm:$0xff]  ;;  %v65_v13 = vld [vmem:[#allocation6 + $0x20] sm:$0xff]  ;;  %v66_v14 = vld [vmem:[#allocation6 + $0x28] sm:$0xff] }
  0x39   :  { %349 = vmatpush3.bf16.msra.mxu0 %v348_v4  ;;  %v354_v12 = vpack.c.bf16 %v64_v11, %v63_v10  ;;  %v357_v15 = vpack.c.bf16 %v66_v14, %v65_v13  ;;  %v67_v16 = vld [vmem:[#allocation6 + $0x30] sm:$0x3]  ;;  %v167_v40 = vsub.s32 0, %v166_v39  ;;  %v56_v41 = vld [vmem:[%s531_s3] sm:$0xff]  ;;  %v172_v42 = vsub.s32 1, %v166_v39 }
  0x3a   :  { %325 = vmatprep.subr.mxu0 %v448_v1  ;;  %352 = vmatpush3.bf16.msra.mxu1 %v351_v9  ;;  %v276_v7 = vsub.s32 2, %v166_v39  ;;  %v281_v8 = vsub.s32 3, %v166_v39  ;;  %v287_v13 = vsub.s32 5, %v166_v39 }
  0x3b   :  { %353 = vmatprep.subr.bf16.mxu1 %v446_v0  ;;  %v168_v43 = vrot.slane %v56_v41, %v167_v40  ;;  %v173_v46 = vrot.slane %v56_v41, %v172_v42 }
  0x3c   :  { %v277_v9 = vrot.slane %v56_v41, %v276_v7 }
  0x3d   :  { %326 = vmatpush3.msra.mxu0 %v60_v5 }
  0x3e   :  { %328 = vmatmul.mubr.msk.f32.vlgmr.msra.gmra.mrb[0].mxu0 %vm68_vm1, %v57_v6  ;;  %355 = vmatpush3.bf16.msra.mxu1 %v354_v12  ;;  %v282_v12 = vrot.slane %v56_v41, %v281_v8 }
  0x3f   :  { %356 = vmatprep.subr.bf16.mxu1 %v446_v0 }
  0x42   :  { %358 = vmatpush3.bf16.msra.mxu1 %v357_v15 }
  0x43   :  { %342 = vmatprep.subr.mxu1 %v448_v1 }
  0x46   :  { %343 = vmatpush3.msk.msra.mxu1 %vm179_vm2, %v67_v16  ;;  %v288_v16 = vrot.slane %v56_v41, %v287_v13 }
 0x111   :  { %v138_v17 = vpop.f32.mrb[0].mxu0 }
 0x112   :  { %v143_v18 = vsel %vm142_vm3, %v138_v17, 0.0  ;;  %v329_v19 = vpop.f32.mrb[1].mxu0 }
 0x113   :  { %v144_v20 = vrot.slane %v143_v18, 4 }
 0x115   :  { %v145_v21 = vadd.f32 %v144_v20, %v143_v18  ;;  %v295_v20 = vsub.s32 4, %v166_v39 }
 0x117   :  { %v146_v22 = vrot.slane %v145_v21, 2 }
 0x119   :  { %v147_v23 = vadd.f32 %v146_v22, %v145_v21  ;;  %v296_v21 = vrot.slane %v56_v41, %v295_v20 }
 0x11b   :  { %v148_v24 = vrot.slane %v147_v23, 1 }
 0x11d   :  { %v149_v25 = vadd.f32 %v148_v24, %v147_v23 }
 0x11f   :  { %v151_v26 = vmul.f32 0.125, %v149_v25 }
 0x121   :  { %v152_v27 = vsub.f32 %v138_v17, %v151_v26 }
 0x123   :  { %v153_v28 = vmul.f32 %v152_v27, %v152_v27 }
 0x125   :  { %v154_v29 = vsel %vm142_vm3, %v153_v28, 0.0 }
 0x126   :  { %v155_v30 = vrot.slane %v154_v29, 4 }
 0x128   :  { %v156_v31 = vadd.f32 %v155_v30, %v154_v29 }
 0x12a   :  { %v157_v32 = vrot.slane %v156_v31, 2 }
 0x12c   :  { %v158_v33 = vadd.f32 %v157_v32, %v156_v31 }
 0x12e   :  { %v159_v34 = vrot.slane %v158_v33, 1 }
 0x130   :  { %v160_v35 = vadd.f32 %v159_v34, %v158_v33 }
 0x132   :  { %v161_v36 = vmul.f32 0.125, %v160_v35 }
 0x134   :  { %v162_v38 = vadd.f32 1e-05, %v161_v36 }
 0x136   :  { %367 = vrsqrt.f32 %v162_v38 }
 0x140   :  { %v368_v44 = vpop.eup %367 }
 0x141   :  { %v164_v45 = vmul.f32 %v368_v44, %v152_v27 }
 0x143   :  { %v169_v47 = vmul.f32 %v168_v43, %v164_v45 }
 0x145   :  { %v174_v48 = vadd.f32 %v173_v46, %v169_v47 }
 0x147   :  { %v175_v49 = vmax.f32 %v174_v48, 0.0 }
 0x149   :  { %345 = vmatmul.mubr.msk.f32.vlgmr.msra.gmra.mrb[0].mxu1 %vm142_vm3, %v175_v49 }
 0x21c   :  { %v249_v50 = vpop.f32.mrb[0].mxu1 }
 0x21d   :  { %v253_v51 = vsel %vm142_vm3, %v249_v50, 0.0  ;;  %v346_v52 = vpop.f32.mrb[1].mxu1 }
 0x21e   :  { %v254_v53 = vrot.slane %v253_v51, 4 }
 0x220   :  { %v255_v54 = vadd.f32 %v254_v53, %v253_v51 }
 0x222   :  { %v256_v55 = vrot.slane %v255_v54, 2 }
 0x224   :  { %v257_v56 = vadd.f32 %v256_v55, %v255_v54 }
 0x226   :  { %v258_v57 = vrot.slane %v257_v56, 1 }
 0x228   :  { %v259_v58 = vadd.f32 %v258_v57, %v257_v56 }
 0x22a   :  { %v260_v59 = vmul.f32 0.125, %v259_v58 }
 0x22c   :  { %v261_v60 = vsub.f32 %v249_v50, %v260_v59 }
 0x22e   :  { %v262_v61 = vmul.f32 %v261_v60, %v261_v60 }
 0x230   :  { %v263_v62 = vsel %vm142_vm3, %v262_v61, 0.0 }
 0x231   :  { %v264_v63 = vrot.slane %v263_v62, 4 }
 0x233   :  { %v265_v0 = vadd.f32 %v264_v63, %v263_v62 }
 0x235   :  { %v266_v1 = vrot.slane %v265_v0, 2 }
 0x237   :  { %v267_v2 = vadd.f32 %v266_v1, %v265_v0 }
 0x239   :  { %v268_v3 = vrot.slane %v267_v2, 1 }
 0x23b   :  { %v269_v4 = vadd.f32 %v268_v3, %v267_v2 }
 0x23d   :  { %v270_v5 = vmul.f32 0.125, %v269_v4 }
 0x23f   :  { %v271_v6 = vadd.f32 1e-05, %v270_v5 }
 0x241   :  { %369 = vrsqrt.f32 %v271_v6 }
 0x24b   :  { %v370_v10 = vpop.eup %369 }
 0x24c   :  { %v273_v11 = vmul.f32 %v370_v10, %v261_v60 }
 0x24e   :  { %v278_v14 = vmul.f32 %v277_v9, %v273_v11 }
 0x250   :  { %v283_v15 = vadd.f32 %v282_v12, %v278_v14 }
 0x252   :  { %v284_v17 = vmax.f32 %v283_v15, 0.0 }
 0x254   :  { %v289_v18 = vmul.f32 %v288_v16, %v284_v17 }
 0x256   :  { %v290_v19 = vsel %vm142_vm3, %v289_v18, 0.0 }
 0x257   :  { %291 = vadd.xlane.f32.xlu0 %v290_v19 }
 0x2e4   :  { %v292_v22 = vpop.xlane.xlu0 %291 }
 0x2e5   :  { %v297_v23 = vadd.f32 %v296_v21, %v292_v22 }
 0x2e7   :  { %299 = vst.msk [vmem:[%s532_s4] sm:$0xff] %vm298_vm4, %v297_v23 }
 0x2e8   :  { %304 = vsyncpa [#allocation3], 1 }
 0x2e9   :  { %305 = vsyncpa [#allocation5], 1 }

</bundles_post_ra>
